<compile_context>
chip_gen: v5e
topology: v5e:2x2
jax: 0.10.0
libtpu: 0.0.40
codegen_flags: <defaults>
</compile_context>

<pallas_src>
import functools

import jax
import jax.numpy as jnp
from jax.experimental import pallas as pl
from jax.experimental.pallas import tpu as pltpu


# ---------------------------------------------------------------------------
# Kernels
# ---------------------------------------------------------------------------

def _odefunc_kernel(x_ref, w_ref, b_ref, o_ref):
    # x_ref: [tile, dp] (dp = pack*64)   w_ref: [dp, dp] (block-diag, -W^T folded)
    # b_ref: [1, dp] f32                 o_ref: [tile, dp]
    y = jnp.dot(x_ref[...], w_ref[...], preferred_element_type=jnp.float32)
    o_ref[...] = jnp.sin(y + b_ref[...]).astype(o_ref.dtype)


def _fused_euler_kernel(x_ref, w_ref, b_ref, o_ref, *, num_steps, dt):
    # Fuses `num_steps` ODE-function evaluations (forward Euler) in one kernel:
    # W/b stay resident in VMEM/vregs, x is streamed in and out exactly once.
    w = w_ref[...]
    mat_dtype = w.dtype
    # Hoist the bias broadcast out of the loop (JAX doesn't CSE broadcast_in_dim).
    b_bc = jnp.broadcast_to(b_ref[...], x_ref.shape).astype(jnp.float32)

    def body(_, xk):
        # Euler state stays f32; cast only at the MXU input.
        y = jnp.dot(xk.astype(mat_dtype), w, preferred_element_type=jnp.float32)
        f = jnp.sin(y + b_bc)
        return xk + jnp.float32(dt) * f

    x0 = x_ref[...].astype(jnp.float32)
    # Fully unrolled short fixed-trip loop -> cross-iteration LLO scheduling.
    xN = jax.lax.fori_loop(0, num_steps, body, x0, unroll=True)
    o_ref[...] = xN.astype(o_ref.dtype)


# ---------------------------------------------------------------------------
# Parameter prep (done ONCE, not per call)
# ---------------------------------------------------------------------------

def default_pack():
    """pack=2 on v5e (native 128-wide MXU), pack=4 on v6e/v7x (256-wide MXU)."""
    try:
        kind = jax.devices()[0].device_kind.lower()
    except Exception:  # pragma: no cover - e.g. CPU interpret mode
        return 4
    return 2 if "v5" in kind else 4


def prepare_odefunc_params(weight, bias, *, pack=4, param_dtype=jnp.bfloat16):
    """Fold the `-1 *` into the Linear params and build the lane-dense
    block-diagonal packing.

    weight: PyTorch-convention [D_out, D_in]; bias: [D_out].
    Returns (w_packed [pack*D_in, pack*D_out] in param_dtype,
             b_packed [1, pack*D_out] f32).
    """
    assert pack >= 1 and (pack * weight.shape[1]) % 128 == 0, (
        "pack must keep the packed width 128-lane dense")
    w_neg_t = (-weight.T).astype(jnp.float32)            # [D_in, D_out]
    eye = jnp.eye(pack, dtype=jnp.float32)
    w_packed = jnp.kron(eye, w_neg_t).astype(param_dtype)  # block-diagonal
    b_packed = jnp.tile(-bias.astype(jnp.float32), pack).reshape(1, -1)
    return w_packed, b_packed


def _pack_batch(x, pack, dtype=None):
    """x [B,64] -> [rows, pack*64], rows padded to a multiple of 8 (sublane)."""
    B, D = x.shape
    rows = -(-B // pack)
    rows = -(-rows // 8) * 8
    b_pad = rows * pack
    if b_pad != B:
        x = jnp.pad(x, ((0, b_pad - B), (0, 0)))
    xp = x.reshape(rows, pack * D)
    if dtype is not None and xp.dtype != dtype:
        xp = xp.astype(dtype)
    return xp, B, b_pad


def _choose_tile(rows, row_tile):
    """Pick a row tile: big (>= fewer grid steps) but >=2 blocks when rows>=16
    so the 'parallel' grid axis can shard across v7x's two TensorCores."""
    if rows <= 8:
        return rows
    half = -(-(rows // 2) // 8) * 8
    return min(row_tile, half, rows)


# ---------------------------------------------------------------------------
# Wrappers
# ---------------------------------------------------------------------------

def odefunc_mlp_forward(t, x, w_packed, b_packed, *, row_tile=2048):
    """Pallas equivalent of ODEfunc_mlp.forward(t, x) == sin(-(x @ W^T + b)).

    t is unused (ConcatFC drops it); kept for signature parity.
    w_packed/b_packed come from prepare_odefunc_params (negation pre-folded).
    """
    del t
    B, D = x.shape
    dp = w_packed.shape[0]
    pack = dp // D
    xp, b_orig, b_pad = _pack_batch(x, pack, dtype=w_packed.dtype)
    rows = xp.shape[0]
    tile = _choose_tile(rows, row_tile)
    in_bytes = jnp.dtype(xp.dtype).itemsize
    out_bytes = jnp.dtype(x.dtype).itemsize
    w_bytes = jnp.dtype(w_packed.dtype).itemsize

    out_p = pl.pallas_call(
        _odefunc_kernel,
        out_shape=jax.ShapeDtypeStruct((rows, dp), x.dtype),
        grid=(pl.cdiv(rows, tile),),
        in_specs=[
            pl.BlockSpec((tile, dp), lambda i: (i, 0)),
            pl.BlockSpec((dp, dp), lambda i: (0, 0)),   # resident across grid
            pl.BlockSpec((1, dp), lambda i: (0, 0)),    # resident across grid
        ],
        out_specs=pl.BlockSpec((tile, dp), lambda i: (i, 0)),
        compiler_params=pltpu.CompilerParams(
            dimension_semantics=("parallel",),
        ),
        cost_estimate=pl.CostEstimate(
            flops=2 * rows * dp * dp + rows * dp,
            transcendentals=rows * dp,
            bytes_accessed=(rows * dp * (in_bytes + out_bytes)
                            + dp * dp * w_bytes + dp * 4),
        ),
    )(xp, w_packed, b_packed)

    out = out_p.reshape(b_pad, D)[:b_orig]
    return out


def odefunc_fused_euler(x, w_packed, b_packed, *, num_steps=8, dt=0.1,
                        row_tile=2048):
    """Integrate x' = sin(-(x @ W^T + b)) with `num_steps` forward-Euler steps
    fused into ONE pallas_call (weights resident, launch/DMA overhead amortized).
    The Euler state is carried in f32 regardless of the matmul dtype."""
    B, D = x.shape
    dp = w_packed.shape[0]
    pack = dp // D
    # State stays f32 across steps; cast to matmul dtype happens in-kernel.
    xp, b_orig, b_pad = _pack_batch(x, pack, dtype=None)
    rows = xp.shape[0]
    tile = _choose_tile(rows, row_tile)
    io_bytes = jnp.dtype(x.dtype).itemsize
    w_bytes = jnp.dtype(w_packed.dtype).itemsize

    kernel = functools.partial(_fused_euler_kernel, num_steps=num_steps, dt=dt)
    out_p = pl.pallas_call(
        kernel,
        out_shape=jax.ShapeDtypeStruct((rows, dp), x.dtype),
        grid=(pl.cdiv(rows, tile),),
        in_specs=[
            pl.BlockSpec((tile, dp), lambda i: (i, 0)),
            pl.BlockSpec((dp, dp), lambda i: (0, 0)),   # resident across grid
            pl.BlockSpec((1, dp), lambda i: (0, 0)),    # resident across grid
        ],
        out_specs=pl.BlockSpec((tile, dp), lambda i: (i, 0)),
        compiler_params=pltpu.CompilerParams(
            dimension_semantics=("parallel",),
        ),
        cost_estimate=pl.CostEstimate(
            flops=num_steps * (2 * rows * dp * dp + 3 * rows * dp),
            transcendentals=num_steps * rows * dp,
            bytes_accessed=(2 * rows * dp * io_bytes
                            + dp * dp * w_bytes + dp * 4),
        ),
    )(xp, w_packed, b_packed)

    out = out_p.reshape(b_pad, D)[:b_orig]
    return out


# ---------------------------------------------------------------------------
# Deterministic init + self-test
# ---------------------------------------------------------------------------

def _init_linear_params(key, dim_in, dim_out, dtype=jnp.float32):
    # nn.Linear default init: U(-1/sqrt(in), 1/sqrt(in)).
    kw, kb = jax.random.split(key)
    bound = 1.0 / (dim_in ** 0.5)
    weight = jax.random.uniform(kw, (dim_out, dim_in), dtype=dtype,
                                minval=-bound, maxval=bound)
    bias = jax.random.uniform(kb, (dim_out,), dtype=dtype,
                              minval=-bound, maxval=bound)
    return weight, bias


if __name__ == "__main__":
    key = jax.random.PRNGKey(0)
    k_x, k_p = jax.random.split(key)

    B, D = 8, 64                 # ODEfunc_mlp hardcodes a 64->64 Linear
    PACK = default_pack()        # 2 on v5e, 4 on v6e/v7x
    x = jax.random.normal(k_x, (B, D), dtype=jnp.float32)
    t = jnp.float32(0.0)         # unused, as in the PyTorch module

    weight, bias = _init_linear_params(k_p, D, D)

    lin = jnp.dot(x, weight.T, precision=jax.lax.Precision.HIGHEST)
    ref = jnp.sin(-(lin + bias))

    # --- f32 params: tight parity with module semantics ---
    w32, b32 = prepare_odefunc_params(weight, bias, pack=PACK,
                                      param_dtype=jnp.float32)
    out32 = jax.block_until_ready(odefunc_mlp_forward(t, x, w32, b32))
    assert out32.shape == (B, D)
    assert jnp.allclose(out32, ref, atol=1e-5, rtol=1e-5)

    # --- bf16 matmul/DMA path (default perf config on v6e/v7x) ---
    wbf, bbf = prepare_odefunc_params(weight, bias, pack=PACK,
                                      param_dtype=jnp.bfloat16)
    outbf = jax.block_until_ready(odefunc_mlp_forward(t, x, wbf, bbf))
    assert outbf.shape == (B, D)
    assert jnp.allclose(outbf, ref, atol=3e-2, rtol=3e-2)

    # --- fused multi-evaluation (forward Euler), weights resident in VMEM ---
    NUM_STEPS, DT = 8, 0.1
    out_euler = jax.block_until_ready(
        odefunc_fused_euler(x, wbf, bbf, num_steps=NUM_STEPS, dt=DT))
    xr = x
    for _ in range(NUM_STEPS):
        lin = jnp.dot(xr, weight.T, precision=jax.lax.Precision.HIGHEST)
        xr = xr + DT * jnp.sin(-(lin + bias))
    assert out_euler.shape == (B, D)
    assert jnp.allclose(out_euler, xr, atol=5e-2, rtol=5e-2)

    print("KERNEL_OK")
</pallas_src>

<mosaic_0001>
module attributes {stable_mosaic.version = 11 : i64} {
  func.func @_odefunc_kernel(%arg0: i32, %arg1: memref<8x256xf32, #tpu.memory_space<vmem>>, %arg2: memref<256x256xf32, #tpu.memory_space<vmem>>, %arg3: memref<1x256xf32, #tpu.memory_space<vmem>>, %arg4: memref<8x256xf32, #tpu.memory_space<vmem>>) attributes {dimension_semantics = [#tpu.dimension_semantics<parallel>], iteration_bounds = array<i64: 1>, scalar_prefetch = 0 : i64, scratch_operands = 0 : i64, tpu.core_type = #tpu.core_type<tc>, window_params = [{transform_indices = @transform_0, window_bounds = array<i64: 8, 256>}, {pipeline_mode = #tpu.pipeline_mode<synchronous>, transform_indices = @transform_1, window_bounds = array<i64: 256, 256>}, {pipeline_mode = #tpu.pipeline_mode<synchronous>, transform_indices = @transform_2, window_bounds = array<i64: 1, 256>}, {transform_indices = @transform_3, window_bounds = array<i64: 8, 256>}]} {
    %c0 = arith.constant 0 : index
    %c0_0 = arith.constant 0 : index
    %0 = vector.load %arg1[%c0, %c0_0] : memref<8x256xf32, #tpu.memory_space<vmem>>, vector<8x256xf32>
    %c0_1 = arith.constant 0 : index
    %c0_2 = arith.constant 0 : index
    %1 = vector.load %arg2[%c0_1, %c0_2] : memref<256x256xf32, #tpu.memory_space<vmem>>, vector<256x256xf32>
    %cst = arith.constant dense<0.000000e+00> : vector<8x256xf32>
    %2 = tpu.matmul %0, %1, %cst {dimension_numbers = #tpu.dot_dimension_numbers<[1], [0], [0], [1], [0, 0, 1, 1], [], []>} : vector<8x256xf32>, vector<256x256xf32>, vector<8x256xf32> -> vector<8x256xf32>
    %c0_3 = arith.constant 0 : index
    %c0_4 = arith.constant 0 : index
    %3 = vector.load %arg3[%c0_3, %c0_4] : memref<1x256xf32, #tpu.memory_space<vmem>>, vector<1x256xf32>
    %4 = vector.broadcast %3 : vector<1x256xf32> to vector<8x256xf32>
    %5 = arith.addf %2, %4 : vector<8x256xf32>
    %6 = math.sin %5 : vector<8x256xf32>
    %c0_5 = arith.constant 0 : index
    %c0_6 = arith.constant 0 : index
    %7 = vector.load %arg4[%c0_5, %c0_6] : memref<8x256xf32, #tpu.memory_space<vmem>>, vector<8x256xf32>
    tpu.vector_store %arg4[%c0_5, %c0_6], %6 {strides = array<i32>} : memref<8x256xf32, #tpu.memory_space<vmem>>, vector<8x256xf32>,
    return
  }
  func.func @transform_0(%arg0: i32) -> (i32, i32) {
    %c0_i32 = arith.constant 0 : i32
    %c0_i32_0 = arith.constant 0 : i32
    return %arg0, %c0_i32 : i32, i32
  }
  func.func @transform_1(%arg0: i32) -> (i32, i32) {
    %c0_i32 = arith.constant 0 : i32
    %c0_i32_0 = arith.constant 0 : i32
    %c0_i32_1 = arith.constant 0 : i32
    return %c0_i32, %c0_i32_0 : i32, i32
  }
  func.func @transform_2(%arg0: i32) -> (i32, i32) {
    %c0_i32 = arith.constant 0 : i32
    %c0_i32_0 = arith.constant 0 : i32
    %c0_i32_1 = arith.constant 0 : i32
    return %c0_i32, %c0_i32_0 : i32, i32
  }
  func.func @transform_3(%arg0: i32) -> (i32, i32) {
    %c0_i32 = arith.constant 0 : i32
    %c0_i32_0 = arith.constant 0 : i32
    return %arg0, %c0_i32 : i32, i32
  }
}

</mosaic_0001>

<bundles_post_ra>
// kernel: tpu_custom_call.1
= control target key start
LH: loop header
LB: loop body
LE: loop exit
PB: predicated region body
PF: predicated region fallthrough
CT: control target
= control target key end

     0   :  { %8 = vsyncpa [#allocation3], 0  ;;  %s845_s0 = inlined_call_operand.hbm [shape: f32[8,256], index: 0, kind: input, shape index: {}]   ;;  %s846_s1 = inlined_call_operand.hbm [shape: f32[256,256], index: 1, kind: input, shape index: {}]   ;;  %s847_s2 = inlined_call_operand.hbm [shape: f32[1,256], index: 2, kind: input, shape index: {}]   ;;  %s848_s3 = inlined_call_operand.hbm [shape: f32[8,256], index: 3, kind: output, shape index: {}]  }
   0x1   :  { %9 = vsyncpa [#allocation6], 0  ;;  %s26_s14 = sshll.u32 %s846_s1, 4  ;;  %s27_s14 = int_to_ptr.hbm [resolvable:$true] %s26_s14 }
   0x2   :  { %10 = vsyncpa [#allocation4], 0  ;;  %s661_s15 = smov [#allocation5]   ;;  %s16_s19 = sshll.u32 %s845_s0, 4  ;;  %s17_s19 = int_to_ptr.hbm [resolvable:$true] %s16_s19 }
   0x3   :  { %s28_s16 = sshll.u32 %s661_s15, 4  ;;  %s662_s20 = smov 256   ;;  %s29_s16 = int_to_ptr.vmem [resolvable:$true] %s28_s16 }
   0x4   :  { %s663_s21 = smov 16   ;;  %s664_s22 = smov [#allocation2]  }
   0x5   :  { %34 = dma.hbm_to_vmem [thread:$0]  %s27_s14, 8192, %s29_s16, [#allocation6], %s662_s20, %s662_s20, %s663_s21  }
   0x6   :  { %s18_s23 = sshll.u32 %s664_s22, 4  ;;  %s40_s26 = sshll.u32 %s847_s2, 4  ;;  %s19_s23 = int_to_ptr.vmem [resolvable:$true] %s18_s23  ;;  %s41_s26 = int_to_ptr.hbm [resolvable:$true] %s40_s26 }
   0x7   :  { %21 = dma.hbm_to_vmem [thread:$0]  %s17_s19, 256, %s19_s23, [#allocation3]  }
   0x8   :  { %s665_s1 = smov [#allocation7]  }
   0x9   :  { %s42_s27 = sshll.u32 %s665_s1, 4  ;;  %s43_s27 = int_to_ptr.vmem [resolvable:$true] %s42_s27 }
   0xa   :  { %45 = dma.hbm_to_vmem [thread:$0]  %s41_s26, 32, %s43_s27, [#allocation6]  }
   0xb   :  { %655 = dma.done.wait [#allocation3], 256  }
   0xc   :  { %656 = vsyncadd [#allocation3], 4294967040 }
   0xd   :  { %657 = dma.done.wait [#allocation6], 8224  }
   0xe   :  { %658 = vsyncadd [#allocation6], 4294959072  ;;  %v90_v0 = vld [vmem:[#allocation5 + $0xf0] sm:$0xff]  ;;  %v91_v1 = vld [vmem:[#allocation5 + $0xf8] sm:$0xff]  ;;  %s673_s0 = smov [#allocation8]   ;;  %s529_s30 = sshll.u32 %s848_s3, 4  ;;  %s530_s30 = int_to_ptr.hbm [resolvable:$true] %s529_s30 }
   0xf   :  { %v88_v2 = vld [vmem:[#allocation5 + $0xe0] sm:$0xff]  ;;  %130 = vmatpush.msra.mxu0 %v90_v0  ;;  %170 = vmatpush.msra.mxu2 %v91_v1  ;;  %v122_v3 = vld [vmem:[#allocation5 + $0x1f0] sm:$0xff]  ;;  %v89_v4 = vld [vmem:[#allocation5 + $0xe8] sm:$0xff]  ;;  %s527_s2 = sshll.u32 %s673_s0, 4  ;;  %s528_s2 = int_to_ptr.vmem [resolvable:$true] %s527_s2 }
  0x10   :  { %v123_v5 = vld [vmem:[#allocation5 + $0x1f8] sm:$0xff]  ;;  %150 = vmatpush.msra.mxu1 %v122_v3  ;;  %v86_v6 = vld [vmem:[#allocation5 + $0xd0] sm:$0xff]  ;;  %v120_v7 = vld [vmem:[#allocation5 + $0x1e0] sm:$0xff] }
  0x11   :  { %190 = vmatpush.msra.mxu3 %v123_v5  ;;  %v87_v8 = vld [vmem:[#allocation5 + $0xd8] sm:$0xff]  ;;  %131 = vmatpush.msra.mxu0 %v88_v2  ;;  %v121_v9 = vld [vmem:[#allocation5 + $0x1e8] sm:$0xff]  ;;  %v118_v10 = vld [vmem:[#allocation5 + $0x1d0] sm:$0xff] }
  0x12   :  { %171 = vmatpush.msra.mxu2 %v89_v4  ;;  %151 = vmatpush.msra.mxu1 %v120_v7  ;;  %v84_v11 = vld [vmem:[#allocation5 + $0xc0] sm:$0xff]  ;;  %v85_v12 = vld [vmem:[#allocation5 + $0xc8] sm:$0xff]  ;;  %v119_v13 = vld [vmem:[#allocation5 + $0x1d8] sm:$0xff] }
  0x13   :  { %191 = vmatpush.msra.mxu3 %v121_v9  ;;  %132 = vmatpush.msra.mxu0 %v86_v6  ;;  %v116_v14 = vld [vmem:[#allocation5 + $0x1c0] sm:$0xff]  ;;  %v117_v15 = vld [vmem:[#allocation5 + $0x1c8] sm:$0xff]  ;;  %v82_v16 = vld [vmem:[#allocation5 + $0xb0] sm:$0xff] }
  0x14   :  { %172 = vmatpush.msra.mxu2 %v87_v8  ;;  %152 = vmatpush.msra.mxu1 %v118_v10  ;;  %v83_v17 = vld [vmem:[#allocation5 + $0xb8] sm:$0xff]  ;;  %v114_v18 = vld [vmem:[#allocation5 + $0x1b0] sm:$0xff]  ;;  %v80_v20 = vld [vmem:[#allocation5 + $0xa0] sm:$0xff] }
  0x15   :  { %192 = vmatpush.msra.mxu3 %v119_v13  ;;  %133 = vmatpush.msra.mxu0 %v84_v11  ;;  %v115_v19 = vld [vmem:[#allocation5 + $0x1b8] sm:$0xff]  ;;  %v81_v21 = vld [vmem:[#allocation5 + $0xa8] sm:$0xff]  ;;  %v112_v22 = vld [vmem:[#allocation5 + $0x1a0] sm:$0xff] }
  0x16   :  { %173 = vmatpush.msra.mxu2 %v85_v12  ;;  %153 = vmatpush.msra.mxu1 %v116_v14  ;;  %v113_v23 = vld [vmem:[#allocation5 + $0x1a8] sm:$0xff]  ;;  %v78_v24 = vld [vmem:[#allocation5 + $0x90] sm:$0xff]  ;;  %v79_v25 = vld [vmem:[#allocation5 + $0x98] sm:$0xff] }
  0x17   :  { %193 = vmatpush.msra.mxu3 %v117_v15  ;;  %134 = vmatpush.msra.mxu0 %v82_v16  ;;  %v110_v26 = vld [vmem:[#allocation5 + $0x190] sm:$0xff]  ;;  %v111_v27 = vld [vmem:[#allocation5 + $0x198] sm:$0xff]  ;;  %v76_v28 = vld [vmem:[#allocation5 + $0x80] sm:$0xff] }
  0x18   :  { %174 = vmatpush.msra.mxu2 %v83_v17  ;;  %154 = vmatpush.msra.mxu1 %v114_v18  ;;  %v77_v29 = vld [vmem:[#allocation5 + $0x88] sm:$0xff]  ;;  %v108_v30 = vld [vmem:[#allocation5 + $0x180] sm:$0xff]  ;;  %v74_v32 = vld [vmem:[#allocation5 + $0x70] sm:$0xff] }
  0x19   :  { %194 = vmatpush.msra.mxu3 %v115_v19  ;;  %135 = vmatpush.msra.mxu0 %v80_v20  ;;  %v109_v31 = vld [vmem:[#allocation5 + $0x188] sm:$0xff]  ;;  %v75_v33 = vld [vmem:[#allocation5 + $0x78] sm:$0xff]  ;;  %v106_v34 = vld [vmem:[#allocation5 + $0x170] sm:$0xff] }
  0x1a   :  { %175 = vmatpush.msra.mxu2 %v81_v21  ;;  %155 = vmatpush.msra.mxu1 %v112_v22  ;;  %v107_v35 = vld [vmem:[#allocation5 + $0x178] sm:$0xff]  ;;  %v72_v36 = vld [vmem:[#allocation5 + $0x60] sm:$0xff]  ;;  %v73_v37 = vld [vmem:[#allocation5 + $0x68] sm:$0xff] }
  0x1b   :  { %195 = vmatpush.msra.mxu3 %v113_v23  ;;  %136 = vmatpush.msra.mxu0 %v78_v24  ;;  %v104_v38 = vld [vmem:[#allocation5 + $0x160] sm:$0xff]  ;;  %v105_v39 = vld [vmem:[#allocation5 + $0x168] sm:$0xff]  ;;  %v70_v40 = vld [vmem:[#allocation5 + $0x50] sm:$0xff] }
  0x1c   :  { %176 = vmatpush.msra.mxu2 %v79_v25  ;;  %156 = vmatpush.msra.mxu1 %v110_v26  ;;  %v71_v41 = vld [vmem:[#allocation5 + $0x58] sm:$0xff]  ;;  %v102_v42 = vld [vmem:[#allocation5 + $0x150] sm:$0xff]  ;;  %v68_v44 = vld [vmem:[#allocation5 + $0x40] sm:$0xff] }
  0x1d   :  { %196 = vmatpush.msra.mxu3 %v111_v27  ;;  %137 = vmatpush.msra.mxu0 %v76_v28  ;;  %v103_v43 = vld [vmem:[#allocation5 + $0x158] sm:$0xff]  ;;  %v69_v45 = vld [vmem:[#allocation5 + $0x48] sm:$0xff]  ;;  %v100_v46 = vld [vmem:[#allocation5 + $0x140] sm:$0xff]  ;;  %v666_v28 = vmov 683565275  }
  0x1e   :  { %177 = vmatpush.msra.mxu2 %v77_v29  ;;  %157 = vmatpush.msra.mxu1 %v108_v30  ;;  %v101_v47 = vld [vmem:[#allocation5 + $0x148] sm:$0xff]  ;;  %v66_v48 = vld [vmem:[#allocation5 + $0x30] sm:$0xff]  ;;  %v67_v49 = vld [vmem:[#allocation5 + $0x38] sm:$0xff]  ;;  %v667_v30 = vmov 2475754826  }
  0x1f   :  { %197 = vmatpush.msra.mxu3 %v109_v31  ;;  %138 = vmatpush.msra.mxu0 %v74_v32  ;;  %v98_v50 = vld [vmem:[#allocation5 + $0x130] sm:$0xff]  ;;  %v99_v51 = vld [vmem:[#allocation5 + $0x138] sm:$0xff]  ;;  %v64_v52 = vld [vmem:[#allocation5 + $0x20] sm:$0xff]  ;;  %v668_v32 = vmov 2131351028  }
  0x20   :  { %178 = vmatpush.msra.mxu2 %v75_v33  ;;  %158 = vmatpush.msra.mxu1 %v106_v34  ;;  %v65_v53 = vld [vmem:[#allocation5 + $0x28] sm:$0xff]  ;;  %v96_v54 = vld [vmem:[#allocation5 + $0x120] sm:$0xff]  ;;  %v62_v56 = vld [vmem:[#allocation5 + $0x10] sm:$0xff]  ;;  %v669_v34 = vmov 2102212464  }
  0x21   :  { %198 = vmatpush.msra.mxu3 %v107_v35  ;;  %139 = vmatpush.msra.mxu0 %v72_v36  ;;  %v97_v55 = vld [vmem:[#allocation5 + $0x128] sm:$0xff]  ;;  %v63_v57 = vld [vmem:[#allocation5 + $0x18] sm:$0xff]  ;;  %v94_v58 = vld [vmem:[#allocation5 + $0x110] sm:$0xff]  ;;  %v670_v36 = vmov 920167782  }
  0x22   :  { %179 = vmatpush.msra.mxu2 %v73_v37  ;;  %159 = vmatpush.msra.mxu1 %v104_v38  ;;  %v95_v59 = vld [vmem:[#allocation5 + $0x118] sm:$0xff]  ;;  %v60_v60 = vld [vmem:[#allocation5] sm:$0xff]  ;;  %v61_v61 = vld [vmem:[#allocation5 + $0x8] sm:$0xff] }
  0x23   :  { %199 = vmatpush.msra.mxu3 %v105_v39  ;;  %140 = vmatpush.msra.mxu0 %v70_v40  ;;  %v58_v62 = vld [vmem:[#allocation2] sm:$0xff]  ;;  %v92_v63 = vld [vmem:[#allocation5 + $0x100] sm:$0xff]  ;;  %v93_v0 = vld [vmem:[#allocation5 + $0x108] sm:$0xff] }
  0x24   :  { %180 = vmatpush.msra.mxu2 %v71_v41  ;;  %160 = vmatpush.msra.mxu1 %v102_v42  ;;  %v59_v1 = vld [vmem:[#allocation2 + $0x8] sm:$0xff]  ;;  %v124_v2 = vld [vmem:[#allocation7] sm:$0x3] }
  0x25   :  { %200 = vmatpush.msra.mxu3 %v103_v43  ;;  %141 = vmatpush.msra.mxu0 %v68_v44  ;;  %v126_v3 = vperm.slane %v124_v2, 0  ;;  %v127_v8 = vperm.slane %v124_v2, 1 }
  0x26   :  { %181 = vmatpush.msra.mxu2 %v69_v45  ;;  %161 = vmatpush.msra.mxu1 %v100_v46  ;;  %v671_v45 = vmov 1326507024  }
  0x27   :  { %201 = vmatpush.msra.mxu3 %v101_v47  ;;  %142 = vmatpush.msra.mxu0 %v66_v48 }
  0x28   :  { %182 = vmatpush.msra.mxu2 %v67_v49  ;;  %162 = vmatpush.msra.mxu1 %v98_v50 }
  0x29   :  { %202 = vmatpush.msra.mxu3 %v99_v51  ;;  %143 = vmatpush.msra.mxu0 %v64_v52 }
  0x2a   :  { %183 = vmatpush.msra.mxu2 %v65_v53  ;;  %163 = vmatpush.msra.mxu1 %v96_v54 }
  0x2b   :  { %203 = vmatpush.msra.mxu3 %v97_v55  ;;  %144 = vmatpush.msra.mxu0 %v62_v56 }
  0x2c   :  { %184 = vmatpush.msra.mxu2 %v63_v57  ;;  %164 = vmatpush.msra.mxu1 %v94_v58 }
  0x2d   :  { %204 = vmatpush.msra.mxu3 %v95_v59  ;;  %145 = vmatpush.msra.mxu0 %v60_v60 }
  0x2e   :  { %185 = vmatpush.msra.mxu2 %v61_v61  ;;  %146 = vmatmul.f32.vlgmr.msra.gmra.mxu0 %v58_v62 }
  0x2f   :  { %186 = vmatmul.f32.vlgmr.msra.gmra.mxu2 %v58_v62  ;;  %165 = vmatpush.msra.mxu1 %v92_v63 }
  0x30   :  { %205 = vmatpush.msra.mxu3 %v93_v0  ;;  %166 = vmatmul.f32.vlgmr.msra.gmra.mxu1 %v59_v1 }
  0x31   :  { %206 = vmatmul.f32.vlgmr.msra.gmra.mxu3 %v59_v1 }
  0xab   :  { %v147_v4 = vpop.f32.mrf.mxu0 }
  0xac   :  { %v148_v5 = vadd.f32 %v147_v4, %v126_v3 }
  0xad   :  { %v167_v6 = vpop.f32.mrf.mxu1 }
  0xae   :  { %v703_v7 = vadd.f32 %v167_v6, %v148_v5 }
  0xb0   :  { %v213_v9 = vand.u32 2139095040, %v703_v7  ;;  %v210_v10 = vand.u32 2147483647, %v703_v7 }
  0xb2   :  { %v187_v11 = vpop.f32.mrf.mxu2  ;;  %v214_v12 = vshrl.u32 %v213_v9, 23  ;;  %v217_v17 = vand.u32 8388607, %v210_v10 }
  0xb3   :  { %v188_v13 = vadd.f32 %v187_v11, %v127_v8 }
  0xb4   :  { %v207_v14 = vpop.f32.mrf.mxu3  ;;  %v540_v15 = vadd.s32 4294967169, %v214_v12  ;;  %v218_v20 = vor.u32 8388608, %v217_v17 }
  0xb5   :  { %v707_v16 = vadd.f32 %v207_v14, %v188_v13 }
  0xb6   :  { %v220_v18 = vadd.s32 1, %v540_v15  ;;  %v718_v38 = vshll.u32 %v218_v20, 8 }
  0xb7   :  { %v368_v19 = vand.u32 2139095040, %v707_v16  ;;  %v365_v22 = vand.u32 2147483647, %v707_v16 }
  0xb8   :  { %vm221_vm0 = vcmp.gt.s32.totalorder %v220_v18, 0  ;;  %v259_v53 = vand.u32 65535, %v718_v38  ;;  %v260_v2 = vshrl.u32 %v718_v38, 16 }
  0xb9   :  { %v222_v21 = vsel %vm221_vm0, %v220_v18, 0  ;;  %v369_v23 = vshrl.u32 %v368_v19, 23  ;;  %v372_v39 = vand.u32 8388607, %v365_v22 }
  0xba   :  { %v223_v24 = vshrl.u32 %v222_v21, 5  ;;  %v224_v25 = vand.u32 31, %v222_v21 }
  0xbb   :  { %v543_v26 = vadd.s32 4294967169, %v369_v23  ;;  %v373_v57 = vor.u32 8388608, %v372_v39  ;;  %v672_v39 = vmov 0  }
  0xbc   :  { %v225_v27 = vsub.s32 32, %v224_v25  ;;  %v227_v29 = vshll.u32 %v666_v28, %v224_v25  ;;  %v230_v31 = vshll.u32 %v667_v30, %v224_v25  ;;  %v233_v33 = vshll.u32 %v668_v32, %v224_v25 }
  0xbd   :  { %v236_v35 = vshll.u32 %v669_v34, %v224_v25  ;;  %v239_v37 = vshll.u32 %v670_v36, %v224_v25  ;;  %vm242_vm1 = vcmp.lt.s32.totalorder %v223_v24, 1  ;;  %vm245_vm2 = vcmp.lt.s32.totalorder %v223_v24, 4 }
  0xbe   :  { %v228_v40 = vshrl.u32 %v667_v30, %v225_v27  ;;  %v231_v41 = vshrl.u32 %v668_v32, %v225_v27  ;;  %v234_v42 = vshrl.u32 %v669_v34, %v225_v27  ;;  %v226_v43 = vshrl.u32 %v666_v28, %v225_v27 }
  0xbf   :  { %v237_v44 = vshrl.u32 %v670_v36, %v225_v27  ;;  %v240_v46 = vshrl.u32 %v671_v45, %v225_v27  ;;  %v375_v50 = vadd.s32 1, %v543_v26  ;;  %vm244_vm3 = vcmp.lt.s32.totalorder %v223_v24, 3 }
  0xc0   :  { %v229_v47 = vor.u32 %v228_v40, %v227_v29  ;;  %v232_v48 = vor.u32 %v231_v41, %v230_v31  ;;  %v235_v49 = vor.u32 %v234_v42, %v233_v33  ;;  %vm243_vm4 = vcmp.lt.s32.totalorder %v223_v24, 2 }
  0xc1   :  { %v238_v51 = vor.u32 %v237_v44, %v236_v35  ;;  %v241_v52 = vor.u32 %v240_v46, %v239_v37  ;;  %vm376_vm5 = vcmp.gt.s32.totalorder %v375_v50, 0  ;;  %v738_v11 = vshll.u32 %v373_v57, 8 }
  0xc2   :  { %v247_v54 = vsel %vm245_vm2, %v235_v49, 2102212464  ;;  %v250_v55 = vsel %vm242_vm1, %v229_v47, %v232_v48  ;;  %v254_v56 = vsel %vm242_vm1, %v232_v48, %v235_v49  ;;  %v246_v60 = vsel %vm242_vm1, %v226_v43, %v229_v47 }
  0xc3   :  { %v251_v58 = vsel %vm245_vm2, %v238_v51, 920167782  ;;  %v255_v59 = vsel %vm245_vm2, %v241_v52, 1326507024  ;;  %v248_v61 = vsel %vm244_vm3, %v232_v48, %v247_v54  ;;  %v377_v3 = vsel %vm376_vm5, %v375_v50, 0 }
  0xc4   :  { %v252_v62 = vsel %vm244_vm3, %v235_v49, %v251_v58  ;;  %v256_v63 = vsel %vm244_vm3, %v238_v51, %v255_v59  ;;  %v736_v9 = vsel %vm243_vm4, %v246_v60, %v248_v61  ;;  %v740_v14 = vshrl.u32 %v377_v3, 5 }
  0xc5   :  { %v253_v0 = vsel %vm243_vm4, %v250_v55, %v252_v62  ;;  %v257_v1 = vsel %vm243_vm4, %v254_v56, %v256_v63  ;;  %v379_v15 = vand.u32 31, %v377_v3 }
  0xc6   :  { %v261_v4 = vand.u32 65535, %v257_v1  ;;  %v262_v5 = vshrl.u32 %v257_v1, 16  ;;  %v283_v6 = vand.u32 65535, %v253_v0  ;;  %v284_v8 = vshrl.u32 %v253_v0, 16 }
  0xc7   :  { %v380_v37 = vsub.s32 32, %v379_v15  ;;  %v382_v46 = vshll.u32 %v666_v28, %v379_v15  ;;  %v385_v49 = vshll.u32 %v667_v30, %v379_v15  ;;  %v388_v55 = vshll.u32 %v668_v32, %v379_v15 }
  0xc8   :  { %v264_v12 = vmul.u32 %v262_v5, %v259_v53  ;;  %v265_v13 = vmul.u32 %v261_v4, %v260_v2  ;;  %v263_v17 = vmul.u32 %v261_v4, %v259_v53  ;;  %v266_v18 = vmul.u32 %v262_v5, %v260_v2 }
  0xc9   :  { %v286_v19 = vmul.u32 %v284_v8, %v259_v53  ;;  %v287_v20 = vmul.u32 %v283_v6, %v260_v2  ;;  %v285_v25 = vmul.u32 %v283_v6, %v259_v53  ;;  %v288_v26 = vmul.u32 %v284_v8, %v260_v2 }
  0xca   :  { %v267_v21 = vshll.u32 %v264_v12, 16  ;;  %v268_v23 = vshrl.u32 %v264_v12, 16  ;;  %v269_v27 = vshll.u32 %v265_v13, 16  ;;  %v270_v29 = vshrl.u32 %v265_v13, 16 }
  0xcb   :  { %v289_v24 = vshll.u32 %v286_v19, 16  ;;  %v290_v31 = vshrl.u32 %v286_v19, 16  ;;  %v291_v35 = vshll.u32 %v287_v20, 16  ;;  %v292_v41 = vshrl.u32 %v287_v20, 16 }
  0xcc   :  { %vm271_vm6 = vc.u32 %v263_v17, %v267_v21  ;;  %v273_v33 = vadd.s32 %v267_v21, %v263_v17  ;;  %v383_v52 = vshrl.u32 %v667_v30, %v380_v37  ;;  %v386_v53 = vshrl.u32 %v668_v32, %v380_v37 }
  0xcd   :  { %v272_v40 = vsel %vm271_vm6, 1, %v672_v39  ;;  %vm293_vm7 = vc.u32 %v285_v25, %v289_v24  ;;  %v295_v42 = vadd.s32 %v289_v24, %v285_v25  ;;  %v389_v56 = vshrl.u32 %v669_v34, %v380_v37 }
  0xce   :  { %v274_v43 = vadd.s32 %v272_v40, %v266_v18  ;;  %vm275_vm8 = vc.u32 %v273_v33, %v269_v27  ;;  %v294_v44 = vsel %vm293_vm7, 1, %v672_v39  ;;  %v391_v57 = vshll.u32 %v669_v34, %v379_v15 }
  0xcf   :  { %v276_v47 = vsel %vm275_vm8, 1, %v672_v39  ;;  %v296_v48 = vadd.s32 %v294_v44, %v288_v26  ;;  %vm297_vm9 = vc.u32 %v295_v42, %v291_v35  ;;  %v384_v59 = vor.u32 %v383_v52, %v382_v46 }
  0xd0   :  { %v278_v50 = vadd.s32 %v276_v47, %v274_v43  ;;  %v298_v51 = vsel %vm297_vm9, 1, %v672_v39  ;;  %v387_v60 = vor.u32 %v386_v53, %v385_v49  ;;  %v392_v61 = vshrl.u32 %v670_v36, %v380_v37 }
  0xd1   :  { %v300_v54 = vadd.s32 %v298_v51, %v296_v48  ;;  %v390_v63 = vor.u32 %v389_v56, %v388_v55  ;;  %v394_v0 = vshll.u32 %v670_v36, %v379_v15  ;;  %v395_v30 = vshrl.u32 %v671_v45, %v380_v37 }
  0xd2   :  { %v279_v58 = vadd.s32 %v278_v50, %v268_v23  ;;  %v758_v2 = vadd.s32 %v295_v42, %v291_v35  ;;  %v393_v32 = vor.u32 %v392_v61, %v391_v57  ;;  %vm397_vm10 = vcmp.lt.s32.totalorder %v740_v14, 1 }
  0xd3   :  { %v301_v62 = vadd.s32 %v300_v54, %v290_v31  ;;  %v396_v34 = vor.u32 %v395_v30, %v394_v0  ;;  %vm400_vm11 = vcmp.lt.s32.totalorder %v740_v14, 4  ;;  %v405_v4 = vsel %vm397_vm10, %v384_v59, %v387_v60 }
  0xd4   :  { %v756_v1 = vadd.s32 %v279_v58, %v270_v29  ;;  %vm399_vm13 = vcmp.lt.s32.totalorder %v740_v14, 3  ;;  %v406_v36 = vsel %vm400_vm11, %v393_v32, 920167782  ;;  %vm398_vm14 = vcmp.lt.s32.totalorder %v740_v14, 2 }
  0xd5   :  { %v302_v3 = vadd.s32 %v301_v62, %v292_v41  ;;  %v407_v5 = vsel %vm399_vm13, %v390_v63, %v406_v36  ;;  %v409_v6 = vsel %vm397_vm10, %v387_v60, %v390_v63  ;;  %v303_v8 = vmul.u32 %v718_v38, %v736_v9 }
  0xd6   :  { %vm305_vm12 = vc.u32 %v756_v1, %v758_v2  ;;  %v408_v12 = vsel %vm398_vm14, %v405_v4, %v407_v5  ;;  %v410_v13 = vsel %vm400_vm11, %v396_v34, 1326507024  ;;  %v414_v15 = vand.u32 65535, %v738_v11 }
  0xd7   :  { %v306_v45 = vadd.s32 1, %v302_v3  ;;  %v411_v18 = vsel %vm399_vm13, %v393_v32, %v410_v13  ;;  %v438_v19 = vand.u32 65535, %v408_v12  ;;  %v439_v20 = vshrl.u32 %v408_v12, 16 }
  0xd8   :  { %v412_v23 = vsel %vm398_vm14, %v409_v6, %v411_v18  ;;  %v415_v38 = vshrl.u32 %v738_v11, 16  ;;  %v381_v24 = vshrl.u32 %v666_v28, %v380_v37  ;;  %v402_v40 = vsel %vm400_vm11, %v390_v63, 2102212464 }
  0xd9   :  { %v307_v17 = vsel %vm305_vm12, %v306_v45, %v302_v3  ;;  %v416_v9 = vand.u32 65535, %v412_v23  ;;  %v417_v25 = vshrl.u32 %v412_v23, 16  ;;  %v441_v26 = vmul.u32 %v439_v20, %v414_v15 }
  0xda   :  { %v308_v21 = vadd.s32 %v307_v17, %v303_v8  ;;  %v442_v29 = vmul.u32 %v438_v19, %v415_v38  ;;  %v440_v41 = vmul.u32 %v438_v19, %v414_v15  ;;  %v443_v47 = vmul.u32 %v439_v20, %v415_v38 }
  0xdb   :  { %v419_v31 = vmul.u32 %v417_v25, %v414_v15  ;;  %v420_v33 = vmul.u32 %v416_v9, %v415_v38  ;;  %v444_v42 = vshll.u32 %v441_v26, 16  ;;  %v418_v43 = vmul.u32 %v416_v9, %v414_v15 }
  0xdc   :  { %v309_v27 = vadd.s32 536870912, %v308_v21  ;;  %v421_v44 = vmul.u32 %v417_v25, %v415_v38  ;;  %v446_v50 = vshll.u32 %v442_v29, 16  ;;  %v401_v53 = vsel %vm397_vm10, %v381_v24, %v384_v59 }
  0xdd   :  { %v422_v46 = vshll.u32 %v419_v31, 16  ;;  %v424_v49 = vshll.u32 %v420_v33, 16  ;;  %vm448_vm15 = vc.u32 %v440_v41, %v444_v42  ;;  %v450_v51 = vadd.s32 %v444_v42, %v440_v41 }
  0xde   :  { %v787_v35 = vshrl.u32 %v309_v27, 30  ;;  %v449_v37 = vsel %vm448_vm15, 1, %v672_v39  ;;  %v403_v56 = vsel %vm399_vm13, %v387_v60, %v402_v40  ;;  %v423_v63 = vshrl.u32 %v419_v31, 16 }
  0xdf   :  { %vm426_vm0 = vc.u32 %v418_v43, %v422_v46  ;;  %v428_v28 = vadd.s32 %v422_v46, %v418_v43  ;;  %v451_v55 = vadd.s32 %v449_v37, %v443_v47  ;;  %vm452_vm2 = vc.u32 %v450_v51, %v446_v50 }
  0xe0   :  { %v311_v48 = vshll.u32 %v787_v35, 30  ;;  %v427_v54 = vsel %vm426_vm0, 1, %v672_v39  ;;  %v453_v62 = vsel %vm452_vm2, 1, %v672_v39  ;;  %v445_v30 = vshrl.u32 %v441_v26, 16 }
  0xe1   :  { %v429_v57 = vadd.s32 %v427_v54, %v421_v44  ;;  %vm430_vm1 = vc.u32 %v428_v28, %v424_v49  ;;  %v455_v32 = vadd.s32 %v453_v62, %v451_v55  ;;  %v425_v3 = vshrl.u32 %v420_v33, 16 }
  0xe2   :  { %v312_v52 = vsub.s32 %v308_v21, %v311_v48  ;;  %v431_v61 = vsel %vm430_vm1, 1, %v672_v39  ;;  %v447_v36 = vshrl.u32 %v442_v29, 16  ;;  %v404_v60 = vsel %vm398_vm14, %v401_v53, %v403_v56 }
  0xe3   :  { %v433_v0 = vadd.s32 %v431_v61, %v429_v57  ;;  %v456_v45 = vadd.s32 %v455_v32, %v445_v30  ;;  %v454_v8 = vadd.s32 %v450_v51, %v446_v50  ;;  %v458_v15 = vmul.u32 %v738_v11, %v404_v60 }
  0xe4   :  { %vm313_vm3 = vcmp.lt.s32.totalorder %v312_v52, 0  ;;  %v314_v58 = vsub.s32 0, %v312_v52  ;;  %v304_v17 = vadd.s32 %v758_v2, %v756_v1  ;;  %vm212_vm7 = vcmp.lt.s32.totalorder %v703_v7, 0 }
  0xe5   :  { %v434_v4 = vadd.s32 %v433_v0, %v423_v63  ;;  %v457_v12 = vadd.s32 %v456_v45, %v447_v36  ;;  %vm811_vm8 = vcmp.le.f32.partialorder %v210_v10, 0.7853982  ;;  %v334_v44 = vsub.s32 4, %v787_v35 }
  0xe6   :  { %v315_v59 = vsel %vm313_vm3, %v314_v58, %v312_v52  ;;  %vm824_vm10 = vcmp.le.f32.partialorder %v365_v22, 0.7853982  ;;  %vm367_vm11 = vcmp.lt.s32.totalorder %v707_v16, 0  ;;  %vm353_vm15 = vweird.f32 %v703_v7 }
  0xe7   :  { %v316_v34 = vclz %v315_v59  ;;  %v435_v6 = vadd.s32 %v434_v4, %v425_v3  ;;  %v461_v39 = vadd.s32 1, %v457_v12  ;;  %v335_v50 = vsel %vm212_vm7, %v334_v44, %v787_v35 }
  0xe8   :  { %v337_v55 = vsel %vm811_vm8, 0, %v335_v50  ;;  %vm508_vm3 = vweird.f32 %v707_v16 }
  0xe9   :  { %v541_v5 = vadd.s32 4294967294, %v316_v34  ;;  %vm460_vm5 = vc.u32 %v435_v6, %v454_v8  ;;  %v354_v59 = vadd.s32 3, %v337_v55 }
  0xea   :  { %v462_v20 = vsel %vm460_vm5, %v461_v39, %v457_v12 }
  0xeb   :  { %vm542_vm4 = vcmp.lt.s32.totalorder %v541_v5, 0  ;;  %v463_v21 = vadd.s32 %v462_v20, %v458_v15 }
  0xec   :  { %v319_v13 = vsel %vm542_vm4, 0, %v541_v5 }
  0xed   :  { %v320_v18 = vsub.s32 32, %v319_v13  ;;  %v324_v19 = vsub.s32 4294967266, %v319_v13  ;;  %v321_v23 = vshll.u32 %v312_v52, %v319_v13  ;;  %v464_v9 = vadd.s32 536870912, %v463_v21 }
  0xee   :  { %v459_v52 = vadd.s32 %v454_v8, %v435_v6  ;;  %v355_v6 = vand.u32 3, %v354_v59 }
  0xef   :  { %v322_v14 = vshrl.u32 %v304_v17, %v320_v18  ;;  %v325_v38 = vadd.s32 127, %v324_v19  ;;  %v805_v27 = vshrl.u32 %v464_v9, 30 }
  0xf0   :  { %vm357_vm12 = vcmp.eq.s32.totalorder %v355_v6, 0  ;;  %vm360_vm13 = vcmp.eq.s32.totalorder %v355_v6, 2  ;;  %vm356_vm14 = vcmp.lt.s32.totalorder %v355_v6, 2 }
  0xf1   :  { %v323_v25 = vor.u32 %v322_v14, %v321_v23  ;;  %v326_v26 = vshll.u32 %v325_v38, 23  ;;  %v466_v24 = vshll.u32 %v805_v27, 30 }
  0xf3   :  { %v327_v29 = vor.u32 4788187, %v326_v26  ;;  %v330_v11 = vcvt.s32.f32 %v323_v25  ;;  %v467_v33 = vsub.s32 %v463_v21, %v466_v24  ;;  %v489_v21 = vsub.s32 4, %v805_v27 }
  0xf5   :  { %v328_v31 = vand.u32 2147483647, %v327_v29  ;;  %vm468_vm6 = vcmp.lt.s32.totalorder %v467_v33, 0  ;;  %v469_v1 = vsub.s32 0, %v467_v33  ;;  %v490_v26 = vsel %vm367_vm11, %v489_v21, %v805_v27 }
  0xf7   :  { %v331_v40 = vmul.f32 %v330_v11, %v328_v31  ;;  %v470_v41 = vsel %vm468_vm6, %v469_v1, %v467_v33  ;;  %v492_v11 = vsel %vm824_vm10, 0, %v490_v26 }
  0xf8   :  { %v471_v46 = vclz %v470_v41 }
  0xf9   :  { %v332_v2 = vxor.u32 2147483648, %v331_v40 }
  0xfa   :  { %v544_v49 = vadd.s32 4294967294, %v471_v46 }
  0xfb   :  { %v333_v43 = vsel %vm212_vm7, %v332_v2, %v331_v40 }
  0xfc   :  { %v336_v47 = vsel %vm811_vm8, %v703_v7, %v333_v43  ;;  %vm545_vm9 = vcmp.lt.s32.totalorder %v544_v49, 0  ;;  %v509_v7 = vadd.s32 3, %v492_v11 }
  0xfd   :  { %v338_v48 = vmul.f32 %v336_v47, %v336_v47  ;;  %v474_v51 = vsel %vm545_vm9, 0, %v544_v49 }
  0xfe   :  { %v475_v53 = vsub.s32 32, %v474_v51  ;;  %v479_v54 = vsub.s32 4294967266, %v474_v51  ;;  %v476_v58 = vshll.u32 %v467_v33, %v474_v51  ;;  %v510_v44 = vand.u32 3, %v509_v7 }
  0xff   :  { %v346_v28 = vmul.f32 -0.00019511016, %v338_v48  ;;  %v339_v37 = vmul.f32 -0.001358992, %v338_v48 }
 0x100   :  { %v477_v61 = vshrl.u32 %v459_v52, %v475_v53  ;;  %v480_v62 = vadd.s32 127, %v479_v54  ;;  %vm512_vm0 = vcmp.eq.s32.totalorder %v510_v44, 0  ;;  %vm515_vm1 = vcmp.eq.s32.totalorder %v510_v44, 2 }
 0x101   :  { %v347_v10 = vadd.f32 0.008332121, %v346_v28  ;;  %v340_v56 = vadd.f32 0.041655596, %v339_v37  ;;  %vm511_vm2 = vcmp.lt.s32.totalorder %v510_v44, 2 }
 0x102   :  { %v478_v30 = vor.u32 %v477_v61, %v476_v58  ;;  %v481_v35 = vshll.u32 %v480_v62, 23 }
 0x103   :  { %v348_v57 = vmul.f32 %v347_v10, %v338_v48  ;;  %v341_v63 = vmul.f32 %v340_v56, %v338_v48 }
 0x104   :  { %v482_v34 = vor.u32 4788187, %v481_v35  ;;  %v485_v60 = vcvt.s32.f32 %v478_v30 }
 0x105   :  { %v349_v0 = vadd.f32 -0.16666654, %v348_v57  ;;  %v342_v32 = vadd.f32 -0.4999988, %v341_v63 }
 0x106   :  { %v483_v45 = vand.u32 2147483647, %v482_v34 }
 0x107   :  { %v350_v3 = vmul.f32 %v349_v0, %v338_v48  ;;  %v343_v4 = vmul.f32 %v342_v32, %v338_v48 }
 0x108   :  { %v486_v12 = vmul.f32 %v485_v60, %v483_v45 }
 0x109   :  { %v351_v36 = vadd.f32 1.0, %v350_v3  ;;  %v344_v5 = vadd.f32 1.0, %v343_v4 }
 0x10a   :  { %v487_v13 = vxor.u32 2147483648, %v486_v12 }
 0x10b   :  { %v352_v8 = vmul.f32 %v351_v36, %v336_v47  ;;  %v361_v39 = vxor.u32 2147483648, %v344_v5 }
 0x10c   :  { %v488_v18 = vsel %vm367_vm11, %v487_v13, %v486_v12 }
 0x10d   :  { %v358_v15 = vxor.u32 2147483648, %v352_v8  ;;  %v362_v20 = vsel %vm360_vm13, %v361_v39, %v352_v8  ;;  %v491_v23 = vsel %vm824_vm10, %v707_v16, %v488_v18 }
 0x10e   :  { %v493_v14 = vmul.f32 %v491_v23, %v491_v23 }
 0x10f   :  { %v359_v19 = vsel %vm357_vm12, %v344_v5, %v358_v15 }
 0x110   :  { %v363_v22 = vsel %vm356_vm14, %v359_v19, %v362_v20  ;;  %v501_v9 = vmul.f32 -0.00019511016, %v493_v14  ;;  %v494_v25 = vmul.f32 -0.001358992, %v493_v14 }
 0x111   :  { %v364_v38 = vsel %vm353_vm15, nan, %v363_v22 }
 0x112   :  { %520 = vst [vmem:[#allocation8] sm:$0xff] %v364_v38  ;;  %v502_v29 = vadd.f32 0.008332121, %v501_v9  ;;  %v495_v24 = vadd.f32 0.041655596, %v494_v25 }
 0x114   :  { %v503_v31 = vmul.f32 %v502_v29, %v493_v14  ;;  %v496_v33 = vmul.f32 %v495_v24, %v493_v14 }
 0x116   :  { %v504_v40 = vadd.f32 -0.16666654, %v503_v31  ;;  %v497_v1 = vadd.f32 -0.4999988, %v496_v33 }
 0x118   :  { %v505_v2 = vmul.f32 %v504_v40, %v493_v14  ;;  %v498_v41 = vmul.f32 %v497_v1, %v493_v14 }
 0x11a   :  { %v506_v42 = vadd.f32 1.0, %v505_v2  ;;  %v499_v43 = vadd.f32 1.0, %v498_v41 }
 0x11c   :  { %v507_v46 = vmul.f32 %v506_v42, %v491_v23  ;;  %v516_v47 = vxor.u32 2147483648, %v499_v43 }
 0x11e   :  { %v513_v48 = vxor.u32 2147483648, %v507_v46  ;;  %v517_v49 = vsel %vm515_vm1, %v516_v47, %v507_v46 }
 0x120   :  { %v514_v27 = vsel %vm512_vm0, %v499_v43, %v513_v48 }
 0x121   :  { %v518_v50 = vsel %vm511_vm2, %v514_v27, %v517_v49 }
 0x122   :  { %v519_v28 = vsel %vm508_vm3, nan, %v518_v50 }
 0x123   :  { %521 = vst [vmem:[#allocation8 + $0x8] sm:$0xff] %v519_v28 }
 0x124   :  { %532 = dma.vmem_to_hbm [thread:$0]  %s528_s2, 256, %s530_s30, [#allocation4]  }
 0x125   :  { %659 = dma.done.wait [#allocation4], 256  }
 0x126   :  { %660 = vsyncadd [#allocation4], 4294967040 }
 0x127   :  { %537 = vsyncpa [#allocation3], 1 }
 0x128   :  { %538 = vsyncpa [#allocation6], 1 }
 0x129   :  { %539 = vsyncpa [#allocation4], 1 }

</bundles_post_ra>
